<compile_context>
chip_gen: v7x
topology: tpu7x:2x2x1
jax: 0.10.0
libtpu: 0.0.40
codegen_flags: <defaults>
</compile_context>

<pallas_src>
import functools

import jax
import jax.numpy as jnp
from jax.experimental import pallas as pl
from jax.experimental.pallas import tpu as pltpu


def _round_up(n, m):
    return pl.cdiv(n, m) * m


def dqn_kernel(x_ref, w1_ref, b1_ref, w2_ref, b2_ref, w3_ref, b3_ref, o_ref):
    # Activations cast to bf16 for the MXU; accumulate in f32; epilogue in f32.
    x = x_ref[...].astype(jnp.bfloat16)

    h1 = jnp.dot(x, w1_ref[...], preferred_element_type=jnp.float32) + b1_ref[...]
    h1 = jnp.maximum(h1, 0.0)

    h2 = jnp.dot(h1.astype(jnp.bfloat16), w2_ref[...],
                 preferred_element_type=jnp.float32) + b2_ref[...]
    h2 = jnp.maximum(h2, 0.0)

    out = jnp.dot(h2.astype(jnp.bfloat16), w3_ref[...],
                  preferred_element_type=jnp.float32) + b3_ref[...]
    o_ref[...] = out.astype(o_ref.dtype)


def _choose_batch_tile(B, block_b):
    """Batch tile: multiple of 8, as large as useful, but keep >=~4 grid
    steps on big batches so dual-TC chips (v7x) shard the parallel axis."""
    tb = min(block_b, _round_up(B, 8))
    if B >= 2048:
        tb = min(tb, max(512, _round_up(pl.cdiv(B, 4), 8)))
    return tb


@functools.partial(jax.jit, static_argnames=("block_b",))
def dqn_forward(x, params, *, block_b=2048):
    """x: [B, input_dim] float32 (or bf16 straight from the producer).
    params: dict of w1,b1,w2,b2,w3,b3 with weights stored as [in, out]."""
    B, in_dim = x.shape
    hid = params["w1"].shape[1]
    out_dim = params["w3"].shape[1]

    # Weights cast to bf16 once (halves their VMEM/DMA cost); biases stay f32.
    w1 = params["w1"].astype(jnp.bfloat16)
    w2 = params["w2"].astype(jnp.bfloat16)
    w3 = params["w3"].astype(jnp.bfloat16)
    b1, b2, b3 = params["b1"], params["b2"], params["b3"]

    tb = _choose_batch_tile(B, block_b)
    grid = (pl.cdiv(B, tb),)  # partial last block handled by Pallas masking

    batch_spec = lambda n: pl.BlockSpec((tb, n), lambda i: (i, 0))
    const_spec = lambda shape: pl.BlockSpec(shape, lambda i: (0, 0))  # resident

    flops = 2 * B * (in_dim * hid + hid * hid + hid * out_dim)
    bytes_accessed = (x.size * x.dtype.itemsize
                      + w1.size * 2 + w2.size * 2 + w3.size * 2
                      + b1.size * 4 + b2.size * 4 + b3.size * 4
                      + B * out_dim * 4)

    out = pl.pallas_call(
        dqn_kernel,
        out_shape=jax.ShapeDtypeStruct((B, out_dim), jnp.float32),
        grid=grid,
        in_specs=[
            batch_spec(in_dim),            # x tile
            const_spec((in_dim, hid)),     # w1 (resident)
            const_spec((1, hid)),          # b1
            const_spec((hid, hid)),        # w2
            const_spec((1, hid)),          # b2
            const_spec((hid, out_dim)),    # w3 (narrow, no lane padding)
            const_spec((1, out_dim)),      # b3
        ],
        out_specs=batch_spec(out_dim),     # narrow output: only out_dim lanes hit HBM
        compiler_params=pltpu.CompilerParams(
            dimension_semantics=("parallel",),
            vmem_limit_bytes=32 * 1024 * 1024),
        cost_estimate=pl.CostEstimate(
            flops=flops, transcendentals=0, bytes_accessed=bytes_accessed),
    )(x, w1, b1, w2, b2, w3, b3)

    return out


def init_dqn_params(key, input_dim, output_dim, hidden_dim=64):
    """Deterministic init mimicking PyTorch Linear default U(-1/sqrt(fan_in), +)."""
    ks = jax.random.split(key, 6)

    def linear(kw, kb, fan_in, fan_out):
        bound = 1.0 / jnp.sqrt(jnp.float32(fan_in))
        # Stored as [in, out] (transpose of torch's [out, in]).
        w = jax.random.uniform(kw, (fan_in, fan_out), jnp.float32, -bound, bound)
        b = jax.random.uniform(kb, (1, fan_out), jnp.float32, -bound, bound)
        return w, b

    w1, b1 = linear(ks[0], ks[1], input_dim, hidden_dim)
    w2, b2 = linear(ks[2], ks[3], hidden_dim, hidden_dim)
    w3, b3 = linear(ks[4], ks[5], hidden_dim, output_dim)
    return {"w1": w1, "b1": b1, "w2": w2, "b2": b2, "w3": w3, "b3": b3}


def dqn_reference(x, p, cast_bf16=False):
    def mm(a, w):
        if cast_bf16:
            a = a.astype(jnp.bfloat16)
            w = w.astype(jnp.bfloat16)
        return jnp.dot(a, w, preferred_element_type=jnp.float32)

    h1 = jnp.maximum(mm(x, p["w1"]) + p["b1"], 0.0)
    h2 = jnp.maximum(mm(h1, p["w2"]) + p["b2"], 0.0)
    return mm(h2, p["w3"]) + p["b3"]


if __name__ == "__main__":
    key = jax.random.PRNGKey(0)
    k_param, k_x = jax.random.split(key)

    batch, input_dim, output_dim, hidden_dim = 8, 16, 4, 64

    params = init_dqn_params(k_param, input_dim, output_dim, hidden_dim)
    x = jax.random.normal(k_x, (batch, input_dim), jnp.float32)

    out = dqn_forward(x, params)
    out = jax.block_until_ready(out)
    assert out.shape == (batch, output_dim)

    # Matches a reference with the same bf16-operand / f32-accumulate numerics.
    ref_bf16 = dqn_reference(x, params, cast_bf16=True)
    assert jnp.allclose(out, ref_bf16, atol=1e-4, rtol=1e-4)

    # And stays close to the exact f32 PyTorch-semantics forward.
    ref_f32 = dqn_reference(x, params, cast_bf16=False)
    assert jnp.allclose(out, ref_f32, atol=5e-2, rtol=5e-2)

    # Also exercise a larger, non-divisible batch (partial last block path).
    k_big = jax.random.PRNGKey(1)
    xb = jax.random.normal(k_big, (3000, input_dim), jnp.float32)
    outb = jax.block_until_ready(dqn_forward(xb, params))
    refb = dqn_reference(xb, params, cast_bf16=True)
    assert outb.shape == (3000, output_dim)
    assert jnp.allclose(outb, refb, atol=1e-4, rtol=1e-4)

    print("KERNEL_OK")
</pallas_src>

<mosaic_0001>
module attributes {stable_mosaic.version = 11 : i64} {
  func.func @dqn_kernel(%arg0: i32, %arg1: memref<8x16xf32, #tpu.memory_space<vmem>>, %arg2: memref<16x64xbf16, #tpu.memory_space<vmem>>, %arg3: memref<1x64xf32, #tpu.memory_space<vmem>>, %arg4: memref<64x64xbf16, #tpu.memory_space<vmem>>, %arg5: memref<1x64xf32, #tpu.memory_space<vmem>>, %arg6: memref<64x4xbf16, #tpu.memory_space<vmem>>, %arg7: memref<1x4xf32, #tpu.memory_space<vmem>>, %arg8: memref<8x4xf32, #tpu.memory_space<vmem>>) attributes {dimension_semantics = [#tpu.dimension_semantics<parallel>], iteration_bounds = array<i64: 1>, scalar_prefetch = 0 : i64, scratch_operands = 0 : i64, tpu.core_type = #tpu.core_type<tc>, window_params = [{transform_indices = @transform_0, window_bounds = array<i64: 8, 16>}, {pipeline_mode = #tpu.pipeline_mode<synchronous>, transform_indices = @transform_1, window_bounds = array<i64: 16, 64>}, {pipeline_mode = #tpu.pipeline_mode<synchronous>, transform_indices = @transform_2, window_bounds = array<i64: 1, 64>}, {pipeline_mode = #tpu.pipeline_mode<synchronous>, transform_indices = @transform_3, window_bounds = array<i64: 64, 64>}, {pipeline_mode = #tpu.pipeline_mode<synchronous>, transform_indices = @transform_4, window_bounds = array<i64: 1, 64>}, {pipeline_mode = #tpu.pipeline_mode<synchronous>, transform_indices = @transform_5, window_bounds = array<i64: 64, 4>}, {pipeline_mode = #tpu.pipeline_mode<synchronous>, transform_indices = @transform_6, window_bounds = array<i64: 1, 4>}, {transform_indices = @transform_7, window_bounds = array<i64: 8, 4>}]} {
    %c0 = arith.constant 0 : index
    %c0_0 = arith.constant 0 : index
    %0 = vector.load %arg1[%c0, %c0_0] : memref<8x16xf32, #tpu.memory_space<vmem>>, vector<8x16xf32>
    %1 = arith.truncf %0 : vector<8x16xf32> to vector<8x16xbf16>
    %c0_1 = arith.constant 0 : index
    %c0_2 = arith.constant 0 : index
    %2 = vector.load %arg2[%c0_1, %c0_2] : memref<16x64xbf16, #tpu.memory_space<vmem>>, vector<16x64xbf16>
    %cst = arith.constant dense<0.000000e+00> : vector<8x64xf32>
    %3 = tpu.matmul %1, %2, %cst {dimension_numbers = #tpu.dot_dimension_numbers<[1], [0], [0], [1], [0, 0, 1, 1], [], []>} : vector<8x16xbf16>, vector<16x64xbf16>, vector<8x64xf32> -> vector<8x64xf32>
    %c0_3 = arith.constant 0 : index
    %c0_4 = arith.constant 0 : index
    %4 = vector.load %arg3[%c0_3, %c0_4] : memref<1x64xf32, #tpu.memory_space<vmem>>, vector<1x64xf32>
    %5 = vector.broadcast %4 : vector<1x64xf32> to vector<8x64xf32>
    %6 = arith.addf %3, %5 : vector<8x64xf32>
    %cst_5 = arith.constant 0.000000e+00 : f32
    %7 = vector.broadcast %cst_5 : f32 to vector<8x64xf32>
    %8 = arith.maximumf %6, %7 : vector<8x64xf32>
    %9 = arith.truncf %8 : vector<8x64xf32> to vector<8x64xbf16>
    %c0_6 = arith.constant 0 : index
    %c0_7 = arith.constant 0 : index
    %10 = vector.load %arg4[%c0_6, %c0_7] : memref<64x64xbf16, #tpu.memory_space<vmem>>, vector<64x64xbf16>
    %cst_8 = arith.constant dense<0.000000e+00> : vector<8x64xf32>
    %11 = tpu.matmul %9, %10, %cst_8 {dimension_numbers = #tpu.dot_dimension_numbers<[1], [0], [0], [1], [0, 0, 1, 1], [], []>} : vector<8x64xbf16>, vector<64x64xbf16>, vector<8x64xf32> -> vector<8x64xf32>
    %c0_9 = arith.constant 0 : index
    %c0_10 = arith.constant 0 : index
    %12 = vector.load %arg5[%c0_9, %c0_10] : memref<1x64xf32, #tpu.memory_space<vmem>>, vector<1x64xf32>
    %13 = vector.broadcast %12 : vector<1x64xf32> to vector<8x64xf32>
    %14 = arith.addf %11, %13 : vector<8x64xf32>
    %cst_11 = arith.constant 0.000000e+00 : f32
    %15 = vector.broadcast %cst_11 : f32 to vector<8x64xf32>
    %16 = arith.maximumf %14, %15 : vector<8x64xf32>
    %17 = arith.truncf %16 : vector<8x64xf32> to vector<8x64xbf16>
    %c0_12 = arith.constant 0 : index
    %c0_13 = arith.constant 0 : index
    %18 = vector.load %arg6[%c0_12, %c0_13] : memref<64x4xbf16, #tpu.memory_space<vmem>>, vector<64x4xbf16>
    %cst_14 = arith.constant dense<0.000000e+00> : vector<8x4xf32>
    %19 = tpu.matmul %17, %18, %cst_14 {dimension_numbers = #tpu.dot_dimension_numbers<[1], [0], [0], [1], [0, 0, 1, 1], [], []>} : vector<8x64xbf16>, vector<64x4xbf16>, vector<8x4xf32> -> vector<8x4xf32>
    %c0_15 = arith.constant 0 : index
    %c0_16 = arith.constant 0 : index
    %20 = vector.load %arg7[%c0_15, %c0_16] : memref<1x4xf32, #tpu.memory_space<vmem>>, vector<1x4xf32>
    %21 = vector.broadcast %20 : vector<1x4xf32> to vector<8x4xf32>
    %22 = arith.addf %19, %21 : vector<8x4xf32>
    %c0_17 = arith.constant 0 : index
    %c0_18 = arith.constant 0 : index
    %23 = vector.load %arg8[%c0_17, %c0_18] : memref<8x4xf32, #tpu.memory_space<vmem>>, vector<8x4xf32>
    tpu.vector_store %arg8[%c0_17, %c0_18], %22 {strides = array<i32>} : memref<8x4xf32, #tpu.memory_space<vmem>>, vector<8x4xf32>,
    return
  }
  func.func @transform_0(%arg0: i32) -> (i32, i32) {
    %c0_i32 = arith.constant 0 : i32
    %c0_i32_0 = arith.constant 0 : i32
    return %arg0, %c0_i32 : i32, i32
  }
  func.func @transform_1(%arg0: i32) -> (i32, i32) {
    %c0_i32 = arith.constant 0 : i32
    %c0_i32_0 = arith.constant 0 : i32
    %c0_i32_1 = arith.constant 0 : i32
    return %c0_i32, %c0_i32_0 : i32, i32
  }
  func.func @transform_2(%arg0: i32) -> (i32, i32) {
    %c0_i32 = arith.constant 0 : i32
    %c0_i32_0 = arith.constant 0 : i32
    %c0_i32_1 = arith.constant 0 : i32
    return %c0_i32, %c0_i32_0 : i32, i32
  }
  func.func @transform_3(%arg0: i32) -> (i32, i32) {
    %c0_i32 = arith.constant 0 : i32
    %c0_i32_0 = arith.constant 0 : i32
    %c0_i32_1 = arith.constant 0 : i32
    return %c0_i32, %c0_i32_0 : i32, i32
  }
  func.func @transform_4(%arg0: i32) -> (i32, i32) {
    %c0_i32 = arith.constant 0 : i32
    %c0_i32_0 = arith.constant 0 : i32
    %c0_i32_1 = arith.constant 0 : i32
    return %c0_i32, %c0_i32_0 : i32, i32
  }
  func.func @transform_5(%arg0: i32) -> (i32, i32) {
    %c0_i32 = arith.constant 0 : i32
    %c0_i32_0 = arith.constant 0 : i32
    %c0_i32_1 = arith.constant 0 : i32
    return %c0_i32, %c0_i32_0 : i32, i32
  }
  func.func @transform_6(%arg0: i32) -> (i32, i32) {
    %c0_i32 = arith.constant 0 : i32
    %c0_i32_0 = arith.constant 0 : i32
    %c0_i32_1 = arith.constant 0 : i32
    return %c0_i32, %c0_i32_0 : i32, i32
  }
  func.func @transform_7(%arg0: i32) -> (i32, i32) {
    %c0_i32 = arith.constant 0 : i32
    %c0_i32_0 = arith.constant 0 : i32
    return %arg0, %c0_i32 : i32, i32
  }
}

</mosaic_0001>

<bundles_post_ra>
// kernel: dqn_forward.1
= control target key start
LH: loop header
LB: loop body
LE: loop exit
PB: predicated region body
PF: predicated region fallthrough
CT: control target
= control target key end

     0   :  { %v331_v0 = vmov 0.0   ;;  %vm332_vm0 = vmmov 0   ;;  %vm44_vm1 = vcmask 130048   ;;  %vm129_vm2 = vcmask 523264   ;;  %s417_s1 = inlined_call_operand.vmem [shape: bf16[16,64], index: 1, kind: input, shape index: {}]   ;;  %s418_s0 = inlined_call_operand.vmem [shape: f32[8,16], index: 0, kind: input, shape index: {}]   ;;  %s419_s3 = inlined_call_operand.vmem [shape: bf16[64,64], index: 3, kind: input, shape index: {}]   ;;  %s420_s5 = inlined_call_operand.vmem [shape: bf16[64,4], index: 5, kind: input, shape index: {}]   ;;  %s421_s2 = inlined_call_operand.vmem [shape: f32[1,64], index: 2, kind: input, shape index: {}]   ;;  %s422_s4 = inlined_call_operand.vmem [shape: f32[1,64], index: 4, kind: input, shape index: {}]   ;;  %s423_s6 = inlined_call_operand.vmem [shape: f32[1,4], index: 6, kind: input, shape index: {}]   ;;  %s424_s7 = inlined_call_operand.vmem [shape: f32[8,4], index: 7, kind: output, shape index: {}]  }
   0x1   :  { %290 = vmatprep.subr.bf16.mxu0 %v331_v0  ;;  %v322_v1 = vld [vmem:[%s417_s1] sm:$0xff]   ;;  %292 = vmatprep.mubr.msk.bf16.mxu0 %vm332_vm0, %v331_v0  ;;  %v324_v5 = vld [vmem:[%s419_s3 + $0x8] sm:$0xff]   ;;  %v325_v6 = vld [vmem:[%s419_s3 + $0x10] sm:$0xff]   ;;  %vm257_vm3 = vcmask 31744  }
   0x2   :  { %v27_v2 = vld [vmem:[%s418_s0] sm:$0xff]  ;;  %296 = vmatprep.subr.bf16.mxu1 %v331_v0  ;;  %304 = vmatprep.mubr.msk.bf16.mxu1 %vm332_vm0, %v331_v0  ;;  %v326_v7 = vld [vmem:[%s419_s3 + $0x18] sm:$0xff]   ;;  %v328_v9 = vld [vmem:[%s420_s5 + $0x8] sm:$0xff]  }
   0x3   :  { %291 = vmatpush3.bf16.msra.mxu0 %v322_v1  ;;  %v28_v3 = vpack.c.bf16 %v27_v2, %v27_v2  ;;  %v323_v4 = vld [vmem:[%s419_s3] sm:$0xff]   ;;  %v329_v18 = vld [vmem:[%s420_s5 + $0x10] sm:$0xff]   ;;  %v330_v19 = vld [vmem:[%s420_s5 + $0x18] sm:$0xff]  }
   0x4   :  { %308 = vmatprep.subr.bf16.mxu0 %v331_v0  ;;  %297 = vmatpush3.bf16.msra.mxu1 %v323_v4  ;;  %v327_v8 = vld [vmem:[%s420_s5] sm:$0xff]  }
   0x5   :  { %298 = vmatprep.subr.bf16.mxu1 %v331_v0  ;;  %v263_v10 = vld [vmem:[%s421_s2] ss:$0 sm:$0xff] }
   0x6   :  { %293 = vmatmul.mubr.msk.bf16.vlgmr.msra.gmra.mrb[0].mxu0 %vm44_vm1, %v28_v3  ;;  %v266_v20 = vld [vmem:[%s422_s4] ss:$0 sm:$0xff] }
   0x7   :  { %316 = vmatprep.mubr.msk.bf16.mxu0 %vm332_vm0, %v331_v0  ;;  %309 = vmatpush3.bf16.msra.mxu0 %v327_v8  ;;  %v272_v28 = vld [vmem:[%s423_s6] ss:$0 sm:$0xff] }
   0x8   :  { %299 = vmatpush3.bf16.msra.mxu1 %v324_v5  ;;  %310 = vmatprep.subr.bf16.mxu0 %v331_v0 }
   0x9   :  { %300 = vmatprep.subr.bf16.mxu1 %v331_v0 }
   0xb   :  { %311 = vmatpush3.bf16.msra.mxu0 %v328_v9 }
   0xc   :  { %301 = vmatpush3.bf16.msra.mxu1 %v325_v6  ;;  %312 = vmatprep.subr.bf16.mxu0 %v331_v0 }
   0xd   :  { %302 = vmatprep.subr.bf16.mxu1 %v331_v0 }
   0xf   :  { %313 = vmatpush3.bf16.msra.mxu0 %v329_v18 }
  0x10   :  { %303 = vmatpush3.bf16.msra.mxu1 %v326_v7  ;;  %314 = vmatprep.subr.bf16.mxu0 %v331_v0 }
  0x13   :  { %315 = vmatpush3.bf16.msra.mxu0 %v330_v19 }
  0xd9   :  { %v82_v11 = vpop.f32.mrb[0].mxu0 }
  0xda   :  { %v83_v12 = vadd.f32 %v263_v10, %v82_v11  ;;  %v294_v13 = vpop.f32.mrb[1].mxu0 }
  0xdb   :  { %v85_v14 = vpop.f32.mrb[2].mxu0 }
  0xdc   :  { %v88_v15 = vmax.f32 %v83_v12, 0.0  ;;  %v295_v16 = vpop.f32.mrb[3].mxu0 }
  0xde   :  { %v89_v17 = vpack.c.bf16 %v88_v15, %v88_v15 }
  0xe0   :  { %305 = vmatmul.mubr.msk.bf16.vlgmr.msra.gmra.mrb[0].mxu1 %vm129_vm2, %v89_v17 }
 0x1b3   :  { %v167_v21 = vpop.f32.mrb[0].mxu1 }
 0x1b4   :  { %v168_v22 = vadd.f32 %v266_v20, %v167_v21  ;;  %v306_v23 = vpop.f32.mrb[1].mxu1 }
 0x1b5   :  { %v170_v24 = vpop.f32.mrb[2].mxu1 }
 0x1b6   :  { %v173_v25 = vmax.f32 %v168_v22, 0.0  ;;  %v307_v26 = vpop.f32.mrb[3].mxu1 }
 0x1b8   :  { %v174_v27 = vpack.c.bf16 %v173_v25, %v173_v25 }
 0x1ba   :  { %317 = vmatmul.mubr.msk.bf16.vlgmr.msra.gmra.mrb[4].mxu0 %vm129_vm2, %v174_v27 }
 0x28d   :  { %v251_v29 = vpop.f32.mrb[4].mxu0 }
 0x28e   :  { %v252_v30 = vadd.f32 %v272_v28, %v251_v29  ;;  %v318_v31 = vpop.f32.mrb[5].mxu0 }
 0x28f   :  { %v254_v32 = vpop.f32.mrb[6].mxu0 }
 0x290   :  { %258 = vst.msk [vmem:[%s424_s7] sm:$0xff] %vm257_vm3, %v252_v30  ;;  %v319_v33 = vpop.f32.mrb[7].mxu0 }

</bundles_post_ra>
